<compile_context>
chip_gen: v7x
topology: tpu7x:2x2x1
jax: 0.10.0
libtpu: 0.0.40
codegen_flags: <defaults>
</compile_context>

<pallas_src>
import numpy as np
import jax
import jax.numpy as jnp
from jax.experimental import pallas as pl
from jax.experimental.pallas import tpu as pltpu


# ----------------------------------------------------------------------------
# Parameter setup (deterministic; mirrors WaveletPositionalEncoding.__init__,
# fallback branch).  Rows 1..n of the original (CLS-prepended) buffer are the
# encodings for positions 0..n-1, which is exactly what forward() adds, so we
# generate positions 0..n-1 directly (shift-free).  Math is done in float64
# and cast to float32, matching numpy->torch.tensor(dtype=float32).
# ----------------------------------------------------------------------------
def precompute_wavelet_pos_enc(dim: int, h: int, w: int) -> jnp.ndarray:
    """Returns pos_enc[0, 1:, :] of shape (h*w, dim), float32."""
    n = h * w
    # fallback features: [sin(2*pi*0/n), cos(2*pi*0/n), sin(2*pi*1/n), ...]
    feats = np.empty(2 * n, dtype=np.float64)
    idx = np.arange(n)
    feats[0::2] = np.sin(2.0 * np.pi * idx / n)
    feats[1::2] = np.cos(2.0 * np.pi * idx / n)

    pos = np.arange(n, dtype=np.float64)[:, None]                 # (n, 1)
    k = np.arange(dim, dtype=np.float64)[None, :]                 # (1, dim)
    feature_idx = (np.arange(n)[:, None] + np.arange(dim)[None, :]) % (2 * n)
    base = feats[feature_idx]                                     # (n, dim)

    kmod = (np.arange(dim) % 4)[None, :]
    enc = np.where(
        kmod == 0, base * np.sin(k * pos / dim),
        np.where(
            kmod == 1, base * np.cos(k * pos / dim),
            np.where(
                kmod == 2, np.tanh(base + k / dim),
                base * np.sin(2.0 * np.pi * pos / n),
            ),
        ),
    )
    return jnp.asarray(enc, dtype=jnp.float32)                    # (n, dim)


# ----------------------------------------------------------------------------
# Pallas kernel: out = x + pos, with pos having a leading dim of 1 (sublane
# broadcast only — no rank-changing broadcast inside the kernel).
# ----------------------------------------------------------------------------
def _pe_add_kernel(x_ref, pos_ref, o_ref):
    o_ref[...] = x_ref[...] + pos_ref[...]


# ----------------------------------------------------------------------------
# Block-size helpers.
# ----------------------------------------------------------------------------
def _pick_rows(B: int, max_rows: int) -> int:
    """Rows per block: either B (full extent) or a multiple of 8 (sublane
    granularity), preferring a divisor of B so there is no padded tail."""
    max_rows = max(1, min(B, int(max_rows)))
    if max_rows >= B:
        return B
    if B <= 8:
        return B                       # can't legally split below 8 sublanes
    t = (max_rows // 8) * 8
    tt = t
    while tt >= 8:                      # prefer divisor of B -> no tail block
        if B % tt == 0:
            return tt
        tt -= 8
    return max(t, 8)                    # multiple of 8; tail block masked


def _pick_lanes(ND: int, max_elems: int) -> int:
    """Lanes per block: either ND (full extent) or a multiple of 128,
    preferring a divisor of ND so there is no padded lane tail."""
    max_elems = max(128, min(ND, (int(max_elems) // 128) * 128))
    if max_elems >= ND:
        return ND
    t = max_elems
    while t >= 128:
        if ND % t == 0:
            return t
        t -= 128
    return max_elems


# ----------------------------------------------------------------------------
# Wrapper: forward pass of WaveletPositionalEncoding (mode='add').
# NOTE: the output aliases x's HBM buffer (input_output_aliases); callers must
# treat x as consumed after this call.
# ----------------------------------------------------------------------------
def wavelet_positional_encoding_add(x: jnp.ndarray, pos_enc: jnp.ndarray,
                                    *, target_block_bytes: int = 4 << 20) -> jnp.ndarray:
    B, N, D = x.shape
    assert pos_enc.shape == (N, D)
    pos_enc = pos_enc.astype(x.dtype)
    ND = N * D

    if ND % 128 == 0:
        out2 = _add_lane_dense(x.reshape(B, ND), pos_enc.reshape(1, ND),
                               target_block_bytes)
        return out2.reshape(B, N, D)
    # Generic fallback for shapes whose flattened row is not 128-aligned:
    # keep the 3-D layout with full (N, D) tiles (stores may be masked when
    # D < 128, but the semantics are identical).
    return _add_generic(x, pos_enc.reshape(1, N, D), target_block_bytes)


def _add_lane_dense(x2, pos2, target_block_bytes):
    B, ND = x2.shape
    itemsize = jnp.dtype(x2.dtype).itemsize
    bytes_per_row = ND * itemsize
    total_bytes = B * bytes_per_row

    # Lane block: whole row if even the minimum legal row block (8 sublanes)
    # fits the budget; otherwise split N*D into 128-multiple chunks.
    min_tb = B if B < 8 else 8
    TD = _pick_lanes(ND, target_block_bytes // (min_tb * itemsize))
    lane_steps = pl.cdiv(ND, TD)

    # Row block: fill the budget, but for inputs larger than a few MiB force
    # >= ~4 total grid steps so writeback overlaps fetch and both v7x TCs get
    # work; tiny inputs stay a single block.
    rows_budget = max(min_tb, target_block_bytes // (TD * itemsize))
    min_total_steps = 4 if total_bytes > (8 << 20) else 1
    want_row_steps = pl.cdiv(min_total_steps, lane_steps)
    if want_row_steps > 1:
        rows_budget = min(rows_budget, pl.cdiv(B, want_row_steps))
    TB = _pick_rows(B, rows_budget)

    grid = (pl.cdiv(B, TB), lane_steps)

    # Working set ~= 2x buffered x block + 2x buffered out block + pos block
    # (aliasing shares only the HBM buffer, not the VMEM windows).
    block_bytes = TB * TD * itemsize
    working = 4 * block_bytes + 2 * TD * itemsize
    vmem_limit = int(max(32 << 20, working + (8 << 20)))

    return pl.pallas_call(
        _pe_add_kernel,
        out_shape=jax.ShapeDtypeStruct((B, ND), x2.dtype),
        grid_spec=pltpu.PrefetchScalarGridSpec(
            num_scalar_prefetch=0,
            grid=grid,
            in_specs=[
                pl.BlockSpec((TB, TD), lambda b, c: (b, c)),   # x rows/lanes
                pl.BlockSpec((1, TD), lambda b, c: (0, c)),    # shared pos row
            ],
            out_specs=pl.BlockSpec((TB, TD), lambda b, c: (b, c)),
        ),
        compiler_params=pltpu.CompilerParams(
            dimension_semantics=("parallel", "parallel"),
            vmem_limit_bytes=vmem_limit,
        ),
        input_output_aliases={0: 0},               # output reuses x's HBM buffer
        cost_estimate=pl.CostEstimate(
            flops=B * ND,
            transcendentals=0,
            bytes_accessed=(2 * B * ND + ND) * itemsize,
        ),
    )(x2, pos2)


def _add_generic(x, pos3, target_block_bytes):
    B, N, D = x.shape
    itemsize = jnp.dtype(x.dtype).itemsize
    bytes_per_row = N * D * itemsize
    total_bytes = B * bytes_per_row

    rows_budget = max(1, target_block_bytes // bytes_per_row)
    if total_bytes > (8 << 20):
        rows_budget = min(rows_budget, pl.cdiv(B, 4))
    TB = _pick_rows(B, rows_budget)
    grid = (pl.cdiv(B, TB),)

    block_bytes = TB * bytes_per_row
    working = 4 * block_bytes + 2 * bytes_per_row
    vmem_limit = int(max(32 << 20, working + (8 << 20)))

    return pl.pallas_call(
        _pe_add_kernel,
        out_shape=jax.ShapeDtypeStruct((B, N, D), x.dtype),
        grid_spec=pltpu.PrefetchScalarGridSpec(
            num_scalar_prefetch=0,
            grid=grid,
            in_specs=[
                pl.BlockSpec((TB, N, D), lambda b: (b, 0, 0)),
                pl.BlockSpec((1, N, D), lambda b: (0, 0, 0)),
            ],
            out_specs=pl.BlockSpec((TB, N, D), lambda b: (b, 0, 0)),
        ),
        compiler_params=pltpu.CompilerParams(
            dimension_semantics=("parallel",),
            vmem_limit_bytes=vmem_limit,
        ),
        input_output_aliases={0: 0},
        cost_estimate=pl.CostEstimate(
            flops=B * N * D,
            transcendentals=0,
            bytes_accessed=(2 * B * N * D + N * D) * itemsize,
        ),
    )(x, pos3)


if __name__ == "__main__":
    # Module config: dim=32, h=8, w=8 -> N = 64 patches, mode='add'
    dim, h, w = 32, 8, 8
    B = 2
    N = h * w

    # TODO(synk): the true pywt.wavedec2 branch has no Pallas equivalent and is
    # unreachable in the reference (pywt never imported -> NameError -> fallback);
    # only the fallback encoding is reproduced here.
    pos_enc = precompute_wavelet_pos_enc(dim, h, w)            # (N, dim) f32

    key = jax.random.PRNGKey(0)
    x = jax.random.normal(key, (B, N, dim), dtype=jnp.float32)

    # Reference computed BEFORE the kernel call: the kernel aliases x's HBM
    # buffer, so x must be treated as consumed after the call.
    ref = x + pos_enc[None, :, :]

    fwd = jax.jit(lambda xx: wavelet_positional_encoding_add(xx, pos_enc))
    out = jax.block_until_ready(fwd(x))

    assert out.shape == (B, N, dim)
    assert jnp.allclose(out, ref, atol=1e-6), "mismatch vs plain-JAX reference"

    print("KERNEL_OK")
</pallas_src>

<mosaic_0001>
module attributes {stable_mosaic.version = 11 : i64} {
  func.func @_pe_add_kernel(%arg0: i32, %arg1: i32, %arg2: memref<2x2048xf32, #tpu.memory_space<vmem>>, %arg3: memref<1x2048xf32, #tpu.memory_space<vmem>>, %arg4: memref<2x2048xf32, #tpu.memory_space<vmem>>) attributes {dimension_semantics = [#tpu.dimension_semantics<parallel>, #tpu.dimension_semantics<parallel>], iteration_bounds = array<i64: 1, 1>, scalar_prefetch = 0 : i64, scratch_operands = 0 : i64, tpu.core_type = #tpu.core_type<tc>, window_params = [{transform_indices = @transform_0, window_bounds = array<i64: 2, 2048>}, {transform_indices = @transform_1, window_bounds = array<i64: 1, 2048>}, {transform_indices = @transform_2, window_bounds = array<i64: 2, 2048>}]} {
    %c0 = arith.constant 0 : index
    %c0_0 = arith.constant 0 : index
    %0 = vector.load %arg2[%c0, %c0_0] : memref<2x2048xf32, #tpu.memory_space<vmem>>, vector<2x2048xf32>
    %c0_1 = arith.constant 0 : index
    %c0_2 = arith.constant 0 : index
    %1 = vector.load %arg3[%c0_1, %c0_2] : memref<1x2048xf32, #tpu.memory_space<vmem>>, vector<1x2048xf32>
    %2 = vector.broadcast %1 : vector<1x2048xf32> to vector<2x2048xf32>
    %3 = arith.addf %0, %2 : vector<2x2048xf32>
    %c0_3 = arith.constant 0 : index
    %c0_4 = arith.constant 0 : index
    %4 = vector.load %arg4[%c0_3, %c0_4] : memref<2x2048xf32, #tpu.memory_space<vmem>>, vector<2x2048xf32>
    tpu.vector_store %arg4[%c0_3, %c0_4], %3 {strides = array<i32>} : memref<2x2048xf32, #tpu.memory_space<vmem>>, vector<2x2048xf32>,
    return
  }
  func.func @transform_0(%arg0: i32, %arg1: i32) -> (i32, i32) {
    %c0_i32 = arith.constant 0 : i32
    return %arg0, %arg1 : i32, i32
  }
  func.func @transform_1(%arg0: i32, %arg1: i32) -> (i32, i32) {
    %c0_i32 = arith.constant 0 : i32
    %c0_i32_0 = arith.constant 0 : i32
    return %c0_i32, %arg1 : i32, i32
  }
  func.func @transform_2(%arg0: i32, %arg1: i32) -> (i32, i32) {
    %c0_i32 = arith.constant 0 : i32
    return %arg0, %arg1 : i32, i32
  }
}

</mosaic_0001>

<bundles_post_ra>
// kernel: _lambda_.1
= control target key start
LH: loop header
LB: loop body
LE: loop exit
PB: predicated region body
PF: predicated region fallthrough
CT: control target
= control target key end

     0   :  { %v19_v0 = vlaneseq  ;;  %v168_v1 = vmov 1983009808   ;;  %s214_s1 = inlined_call_operand.vmem [shape: f32[1,2048], index: 1, kind: input, shape index: {}]   ;;  %s215_s0 = inlined_call_operand.vmem [shape: f32[2,2048], index: 0, kind: input, shape index: {}, may-alias: {0,2}]   ;;  %s216_s2 = inlined_call_operand.vmem [shape: f32[2,2048], index: 2, kind: output, shape index: {}, may-alias: {0,2}]  }
   0x1   :  { %v86_v2 = vunpack.c.l.s4 %v168_v1  ;;  %v15_v4 = vld [vmem:[%s214_s1] sm:$0xff]  ;;  %v16_v14 = vld [vmem:[%s214_s1 + $0x8] sm:$0xff]  ;;  %v13_v49 = vld [vmem:[%s215_s0 + $0x10] sm:$0xff] }
   0x2   :  { %v20_v3 = vshrl.u32 %v19_v0, 7  ;;  %v11_v35 = vld [vmem:[%s215_s0] sm:$0xff]  ;;  %v12_v48 = vld [vmem:[%s215_s0 + $0x8] sm:$0xff] }
   0x3   :  { %v87_v5 = vunpack.c.0.s8 %v86_v2 }
   0x4   :  { %v21_v6 = vsub.s32 0, %v20_v3  ;;  %v25_v7 = vsub.s32 1, %v20_v3  ;;  %v29_v8 = vsub.s32 2, %v20_v3  ;;  %v33_v9 = vsub.s32 3, %v20_v3 }
   0x5   :  { %v90_v10 = vsub.s32 %v87_v5, %v20_v3  ;;  %v37_v11 = vsub.s32 4, %v20_v3  ;;  %v41_v12 = vsub.s32 5, %v20_v3  ;;  %v45_v13 = vsub.s32 6, %v20_v3 }
   0x6   :  { %v22_v15 = vrot.slane %v15_v4, %v21_v6  ;;  %v26_v16 = vrot.slane %v15_v4, %v25_v7  ;;  %v30_v17 = vrot.slane %v15_v4, %v29_v8  ;;  %v34_v18 = vrot.slane %v15_v4, %v33_v9 }
   0x7   :  { %v38_v19 = vrot.slane %v15_v4, %v37_v11  ;;  %v42_v20 = vrot.slane %v15_v4, %v41_v12  ;;  %v46_v21 = vrot.slane %v15_v4, %v45_v13  ;;  %v49_v22 = vsub.s32 7, %v20_v3 }
   0x8   :  { %v83_v23 = vcombine.low %v22_v15, %v26_v16  ;;  %v84_v24 = vcombine.low %v30_v17, %v34_v18  ;;  %v54_v25 = vrot.slane %v16_v14, %v21_v6  ;;  %v58_v26 = vrot.slane %v16_v14, %v25_v7 }
   0x9   :  { %v50_v27 = vrot.slane %v15_v4, %v49_v22  ;;  %v100_v28 = vcombine.low %v38_v19, %v42_v20  ;;  %v62_v29 = vrot.slane %v16_v14, %v29_v8  ;;  %v66_v30 = vrot.slane %v16_v14, %v33_v9 }
   0xa   :  { %v91_v31 = vrot.slane %v83_v23, %v90_v10  ;;  %v98_v32 = vrot.slane %v84_v24, %v90_v10  ;;  %v117_v33 = vcombine.low %v54_v25, %v58_v26  ;;  %v70_v34 = vrot.slane %v16_v14, %v37_v11 }
   0xb   :  { %v101_v36 = vcombine.low %v46_v21, %v50_v27  ;;  %v108_v37 = vrot.slane %v100_v28, %v90_v10  ;;  %v118_v38 = vcombine.low %v62_v29, %v66_v30  ;;  %v74_v39 = vrot.slane %v16_v14, %v41_v12 }
   0xc   :  { %v99_v40 = vcombine.low %v91_v31, %v98_v32  ;;  %v125_v41 = vrot.slane %v117_v33, %v90_v10  ;;  %v78_v42 = vrot.slane %v16_v14, %v45_v13  ;;  %v82_v43 = vrot.slane %v16_v14, %v49_v22 }
   0xd   :  { %v115_v44 = vrot.slane %v101_v36, %v90_v10  ;;  %v132_v45 = vrot.slane %v118_v38, %v90_v10  ;;  %v134_v46 = vcombine.low %v70_v34, %v74_v39 }
   0xe   :  { %v155_v47 = vadd.f32 %v99_v40, %v11_v35  ;;  %v135_v50 = vcombine.low %v78_v42, %v82_v43 }
   0xf   :  { %v116_v51 = vcombine.low %v108_v37, %v115_v44  ;;  %v133_v52 = vcombine.low %v125_v41, %v132_v45  ;;  %v142_v53 = vrot.slane %v134_v46, %v90_v10 }
  0x10   :  { %159 = vst [vmem:[%s216_s2] sm:$0xff] %v155_v47  ;;  %v149_v54 = vrot.slane %v135_v50, %v90_v10 }
  0x11   :  { %v156_v55 = vadd.f32 %v116_v51, %v12_v48  ;;  %v157_v56 = vadd.f32 %v133_v52, %v13_v49 }
  0x12   :  { %v150_v58 = vcombine.low %v142_v53, %v149_v54 }
  0x17   :  { %v14_v57 = vld [vmem:[%s215_s0 + $0x18] sm:$0xff] }
  0x18   :  { %160 = vst [vmem:[%s216_s2 + $0x8] sm:$0xff] %v156_v55  ;;  %161 = vst [vmem:[%s216_s2 + $0x10] sm:$0xff] %v157_v56  ;;  %v158_v59 = vadd.f32 %v150_v58, %v14_v57 }
  0x1a   :  { %162 = vst [vmem:[%s216_s2 + $0x18] sm:$0xff] %v158_v59 }

</bundles_post_ra>
